<compile_context>
chip_gen: v5e
topology: v5e:2x2
jax: 0.10.0
libtpu: 0.0.40
codegen_flags: <defaults>
</compile_context>

<pallas_src>
import functools

import jax
import jax.numpy as jnp
import numpy as np
from jax.experimental import pallas as pl
from jax.experimental.pallas import tpu as pltpu

EPSILON = 1e-8
MSE_SCALE = 1.0
CE_SCALE = 0.5

_OUT_LANES = 128  # lane-dense packed scalar output: lane0=cmpm, lane1=rn, lane2=id


# ----------------------------------------------------------------------------- fused kernel
def _fused_loss_kernel(lab_col_ref, lab_row_ref, img_ref, txt_ref,
                       vrn_ref, trn_ref, vid_ref, tid_ref,
                       out_ref, log_mask_scr, acc_scr, *, epsilon):
    p = pl.program_id(0)
    last = pl.num_programs(0) - 1

    # ---------------- step 0: label log-mask -> scratch; zero the cmpm accumulator -----
    @pl.when(p == 0)
    def _():
        lab_col = lab_col_ref[...]                                  # (B, 1) int32
        lab_row = lab_row_ref[...]                                  # (1, B) int32
        mask = (lab_col == lab_row).astype(jnp.float32)             # (B, B) 0/1
        # NOTE: mask is a *symmetric* label-equality mask, so the column norms used here
        # equal the row norms torch divides by (labels_mask_norm = mask / mask.norm(dim=1)).
        # If the mask definition ever changes this identity must be re-checked.
        col_sum = jnp.sum(mask, axis=0, keepdims=True)              # (1, B)
        log_mask_scr[...] = jnp.log(mask * jax.lax.rsqrt(col_sum) + epsilon)
        acc_scr[...] = jnp.zeros_like(acc_scr)

    # ---------------- per-pair CMPM ------------------------------------------------------
    img = img_ref[...].astype(jnp.float32)                          # (B, D)
    txt = txt_ref[...].astype(jnp.float32)                          # (B, D)
    B = img.shape[0]

    img_sq = jnp.sum(img * img, axis=1, keepdims=True)              # (B, 1)
    txt_sq = jnp.sum(txt * txt, axis=1, keepdims=True)
    img_rn = jax.lax.rsqrt(img_sq)                                  # EUP
    txt_rn = jax.lax.rsqrt(txt_sq)
    img_n = img * img_rn                                            # row-normalized
    txt_n = txt * txt_rn
    img_norm = img_sq * img_rn                                      # ||img||_row, (B, 1)
    txt_norm = txt_sq * txt_rn                                      # ||txt||_row, (B, 1)

    # Single bf16 MXU Gram matrix per pair; both logit matrices are row scalings of it:
    #   image_proj_text = ||img||_row * S,   text_proj_image = ||txt||_row * S.T
    s = jax.lax.dot_general(img_n.astype(jnp.bfloat16),
                            txt_n.astype(jnp.bfloat16),
                            (((1,), (1,)), ((), ())),
                            preferred_element_type=jnp.float32)     # (B, B) f32 acc
    i2t = img_norm * s
    t2i = txt_norm * s.T                                            # XLU transpose

    log_mask = log_mask_scr[...]

    def cmpm_dir(logits):
        m = jnp.max(logits, axis=1, keepdims=True)                  # (B, 1)
        e = jnp.exp(logits - m)                                     # (B, B), EUP
        ssum = jnp.sum(e, axis=1, keepdims=True)                    # (B, 1)
        logsm = (logits - m) - jnp.log(ssum)                        # log_softmax
        pred = e * pl.reciprocal(ssum, approx=True)                 # softmax, EUP recip
        comb = pred * (logsm - log_mask)
        row = jnp.sum(comb, axis=1, keepdims=True)                  # (B, 1)
        return jnp.sum(row, axis=0, keepdims=True)                  # (1, 1)

    # sum over pairs of (mean over batch of row-sums) == total / B
    acc_scr[...] += (cmpm_dir(i2t) + cmpm_dir(t2i)) * (1.0 / B)

    # ---------------- last step: MSE align + ID CE + packed output ----------------------
    @pl.when(p == last)
    def _():
        # MSE (RN align)
        d = vrn_ref[...].astype(jnp.float32) - trn_ref[...].astype(jnp.float32)
        n_el = d.shape[0] * d.shape[1]
        rn = jnp.sum(jnp.sum(d * d, axis=1, keepdims=True),
                     axis=0, keepdims=True) * (MSE_SCALE / n_el)    # (1, 1)

        # ID loss: two cross entropies (mean reduction); one-hot + picked reduce shared.
        lab_col = lab_col_ref[...]                                  # (B, 1) int32
        vid = vid_ref[...].astype(jnp.float32)                      # (B, C)
        tid = tid_ref[...].astype(jnp.float32)
        Bc, C = vid.shape

        def lse(x):
            m = jnp.max(x, axis=1, keepdims=True)
            return m + jnp.log(jnp.sum(jnp.exp(x - m), axis=1, keepdims=True))

        cls = jax.lax.broadcasted_iota(jnp.int32, (Bc, C), 1)
        onehot = (cls == lab_col).astype(jnp.float32)
        picked = jnp.sum((vid + tid) * onehot, axis=1, keepdims=True)      # (B, 1)
        idl = jnp.sum(lse(vid) + lse(tid) - picked,
                      axis=0, keepdims=True) * (CE_SCALE / Bc)             # (1, 1)

        cmpm = acc_scr[...]                                                # (1, 1)

        lane = jax.lax.broadcasted_iota(jnp.int32, (1, _OUT_LANES), 1)
        zeros = jnp.zeros((1, _OUT_LANES), jnp.float32)
        out_ref[...] = jnp.where(lane == 0, cmpm,
                       jnp.where(lane == 1, rn,
                       jnp.where(lane == 2, idl, zeros)))


def fused_losses(img_stack, txt_stack, v_rn, t_rn, v_id, t_id, labels,
                 epsilon=EPSILON):
    """Single fused pallas_call, pipelined over the P feature pairs.

    img_stack, txt_stack: (P, B, D) f32; v_rn, t_rn: (B, Dr) f32;
    v_id, t_id: (B, C) f32; labels: (B,) int -> (cmpm, rn, id) scalars.
    """
    P, B, D = img_stack.shape
    Dr = v_rn.shape[1]
    C = v_id.shape[1]
    lab_col = labels.astype(jnp.int32).reshape(B, 1)
    lab_row = labels.astype(jnp.int32).reshape(1, B)

    out = pl.pallas_call(
        functools.partial(_fused_loss_kernel, epsilon=epsilon),
        out_shape=jax.ShapeDtypeStruct((1, _OUT_LANES), jnp.float32),
        grid=(P,),
        in_specs=[
            pl.BlockSpec((B, 1), lambda p: (0, 0)),           # labels column (int32)
            pl.BlockSpec((1, B), lambda p: (0, 0)),           # labels row (int32)
            pl.BlockSpec((None, B, D), lambda p: (p, 0, 0)),  # image features, pair p
            pl.BlockSpec((None, B, D), lambda p: (p, 0, 0)),  # text features, pair p
            pl.BlockSpec((B, Dr), lambda p: (0, 0)),          # v_rn (resident)
            pl.BlockSpec((B, Dr), lambda p: (0, 0)),          # t_rn (resident)
            pl.BlockSpec((B, C), lambda p: (0, 0)),           # v_id logits (resident)
            pl.BlockSpec((B, C), lambda p: (0, 0)),           # t_id logits (resident)
        ],
        out_specs=pl.BlockSpec((1, _OUT_LANES), lambda p: (0, 0)),
        scratch_shapes=[
            pltpu.VMEM((B, B), jnp.float32),   # log_mask (computed once at step 0)
            pltpu.VMEM((1, 1), jnp.float32),   # cmpm accumulator across pairs
        ],
        compiler_params=pltpu.CompilerParams(
            dimension_semantics=("arbitrary",)),   # pair axis carries the accumulator
    )(lab_col, lab_row, img_stack, txt_stack, v_rn, t_rn, v_id, t_id)
    return out[0, 0], out[0, 1], out[0, 2]


# ----------------------------------------------------------------------------- Loss module
class LossPallas:
    def __init__(self, feature_size, num_classes, epsilon=EPSILON,
                 CMPM=True, RNAlign=True, IDLoss=True):
        self.CMPM = CMPM
        self.RNAlign = RNAlign
        self.IDLoss = IDLoss
        self.epsilon = epsilon
        self.num_classes = num_classes
        # xavier_uniform_ equivalent, deterministic (W is unused in forward, kept for parity)
        limit = float(np.sqrt(6.0 / (feature_size + num_classes)))
        self.W = jax.random.uniform(jax.random.PRNGKey(42),
                                    (feature_size, num_classes),
                                    minval=-limit, maxval=limit, dtype=jnp.float32)

    def __call__(self, img_f3, img_f4, img_f41, img_f42, img_f43, img_f44, img_f45,
                 img_f46, txt_f3, txt_f4, txt_f41, txt_f42, txt_f43, txt_f44, txt_f45,
                 txt_f46, v_rn, t_rn, v_id, t_id, labels):
        # TODO(synk): producer should emit the (P,B,D) layout directly (or switch to the
        # 16-ref manual-DMA path) to remove this extra HBM copy at production sizes.
        img_stack = jnp.stack([img_f3, img_f41, img_f42, img_f43,
                               img_f44, img_f45, img_f46, img_f4], axis=0)
        txt_stack = jnp.stack([txt_f3, txt_f41, txt_f42, txt_f43,
                               txt_f44, txt_f45, txt_f46, txt_f4], axis=0)
        cmpm, rn, idl = fused_losses(img_stack, txt_stack, v_rn, t_rn, v_id, t_id,
                                     labels, self.epsilon)
        # All three losses are computed in the fused kernel (cheap); disabled terms
        # are zeroed here to preserve the original module's output semantics.
        if not self.CMPM:
            cmpm = jnp.float32(0.0)
        if not self.RNAlign:
            rn = jnp.float32(0.0)
        if not self.IDLoss:
            idl = jnp.float32(0.0)
        return cmpm, rn, idl


# ----------------------------------------------------------------------------- pure-JAX reference
def _cmpm_ref(img, txt, labels, eps):
    B = img.shape[0]
    lab = labels.reshape(B, 1).astype(jnp.float32)
    mask = ((lab - lab.T) == 0).astype(jnp.float32)
    img_n = img / jnp.linalg.norm(img, axis=1, keepdims=True)
    txt_n = txt / jnp.linalg.norm(txt, axis=1, keepdims=True)
    ipt = img @ txt_n.T
    tpi = txt @ img_n.T
    mask_norm = mask / jnp.linalg.norm(mask, axis=1)  # torch-style (B,B)/(B,) broadcast
    i2t = jax.nn.softmax(ipt, 1) * (jax.nn.log_softmax(ipt, 1) - jnp.log(mask_norm + eps))
    t2i = jax.nn.softmax(tpi, 1) * (jax.nn.log_softmax(tpi, 1) - jnp.log(mask_norm + eps))
    return jnp.mean(jnp.sum(i2t, 1)) + jnp.mean(jnp.sum(t2i, 1))


def _ce_ref(logits, labels):
    logp = jax.nn.log_softmax(logits, axis=1)
    return -jnp.mean(logp[jnp.arange(logits.shape[0]), labels])


if __name__ == "__main__":
    B, D, C = 8, 32, 16          # batch, feature_size, num_classes
    key = jax.random.PRNGKey(0)
    keys = jax.random.split(key, 24)

    img_feats = [jax.random.normal(keys[i], (B, D), jnp.float32) for i in range(8)]
    txt_feats = [jax.random.normal(keys[8 + i], (B, D), jnp.float32) for i in range(8)]
    v_rn = jax.random.normal(keys[16], (B, D), jnp.float32)
    t_rn = jax.random.normal(keys[17], (B, D), jnp.float32)
    v_id = jax.random.normal(keys[18], (B, C), jnp.float32)
    t_id = jax.random.normal(keys[19], (B, C), jnp.float32)
    labels = jax.random.randint(keys[20], (B,), 0, 4).astype(jnp.int32)

    img_f3, img_f41, img_f42, img_f43, img_f44, img_f45, img_f46, img_f4 = img_feats
    txt_f3, txt_f41, txt_f42, txt_f43, txt_f44, txt_f45, txt_f46, txt_f4 = txt_feats

    loss_mod = LossPallas(feature_size=D, num_classes=C, epsilon=EPSILON)
    cmpm, rn, idl = loss_mod(img_f3, img_f4, img_f41, img_f42, img_f43, img_f44,
                             img_f45, img_f46, txt_f3, txt_f4, txt_f41, txt_f42,
                             txt_f43, txt_f44, txt_f45, txt_f46,
                             v_rn, t_rn, v_id, t_id, labels)
    jax.block_until_ready((cmpm, rn, idl))

    # reference check (f32 reference; cmpm tolerance loosened for the bf16 MXU operands)
    cmpm_ref = sum(_cmpm_ref(i, t, labels, EPSILON)
                   for i, t in [(img_f3, txt_f3), (img_f41, txt_f41), (img_f42, txt_f42),
                                (img_f43, txt_f43), (img_f44, txt_f44), (img_f45, txt_f45),
                                (img_f46, txt_f46), (img_f4, txt_f4)])
    rn_ref = jnp.mean((v_rn - t_rn) ** 2) * MSE_SCALE
    id_ref = (_ce_ref(v_id, labels) + _ce_ref(t_id, labels)) * CE_SCALE

    np.testing.assert_allclose(np.asarray(cmpm), np.asarray(cmpm_ref), rtol=2e-2, atol=2e-2)
    np.testing.assert_allclose(np.asarray(rn), np.asarray(rn_ref), rtol=1e-5, atol=1e-6)
    np.testing.assert_allclose(np.asarray(idl), np.asarray(id_ref), rtol=1e-4, atol=1e-6)

    print("KERNEL_OK")
</pallas_src>

<mosaic_0001>
module attributes {stable_mosaic.version = 11 : i64} {
  func.func @_fused_loss_kernel(%arg0: i32, %arg1: memref<8x1xi32, #tpu.memory_space<vmem>>, %arg2: memref<1x8xi32, #tpu.memory_space<vmem>>, %arg3: memref<1x8x32xf32, #tpu.memory_space<vmem>>, %arg4: memref<1x8x32xf32, #tpu.memory_space<vmem>>, %arg5: memref<8x32xf32, #tpu.memory_space<vmem>>, %arg6: memref<8x32xf32, #tpu.memory_space<vmem>>, %arg7: memref<8x16xf32, #tpu.memory_space<vmem>>, %arg8: memref<8x16xf32, #tpu.memory_space<vmem>>, %arg9: memref<1x128xf32, #tpu.memory_space<vmem>>, %arg10: memref<8x8xf32, #tpu.memory_space<vmem>>, %arg11: memref<1x1xf32, #tpu.memory_space<vmem>>) attributes {dimension_semantics = [#tpu.dimension_semantics<arbitrary>], iteration_bounds = array<i64: 8>, scalar_prefetch = 0 : i64, scratch_operands = 2 : i64, tpu.core_type = #tpu.core_type<tc>, window_params = [{pipeline_mode = #tpu.pipeline_mode<synchronous>, transform_indices = @transform_0, window_bounds = array<i64: 8, 1>}, {pipeline_mode = #tpu.pipeline_mode<synchronous>, transform_indices = @transform_1, window_bounds = array<i64: 1, 8>}, {transform_indices = @transform_2, window_bounds = array<i64: 1, 8, 32>}, {transform_indices = @transform_3, window_bounds = array<i64: 1, 8, 32>}, {pipeline_mode = #tpu.pipeline_mode<synchronous>, transform_indices = @transform_4, window_bounds = array<i64: 8, 32>}, {pipeline_mode = #tpu.pipeline_mode<synchronous>, transform_indices = @transform_5, window_bounds = array<i64: 8, 32>}, {pipeline_mode = #tpu.pipeline_mode<synchronous>, transform_indices = @transform_6, window_bounds = array<i64: 8, 16>}, {pipeline_mode = #tpu.pipeline_mode<synchronous>, transform_indices = @transform_7, window_bounds = array<i64: 8, 16>}, {pipeline_mode = #tpu.pipeline_mode<synchronous>, transform_indices = @transform_8, window_bounds = array<i64: 1, 128>}]} {
    %c0_i32 = arith.constant 0 : i32
    %0 = arith.cmpi eq, %arg0, %c0_i32 : i32
    %1 = arith.extui %0 : i1 to i32
    %c0_i32_0 = arith.constant 0 : i32
    %2 = arith.cmpi ne, %1, %c0_i32_0 : i32
    scf.if %2 {
      %c0_24 = arith.constant 0 : index
      %c0_25 = arith.constant 0 : index
      %81 = vector.load %arg1[%c0_24, %c0_25] : memref<8x1xi32, #tpu.memory_space<vmem>>, vector<8x1xi32>
      %c0_26 = arith.constant 0 : index
      %c0_27 = arith.constant 0 : index
      %82 = vector.load %arg2[%c0_26, %c0_27] : memref<1x8xi32, #tpu.memory_space<vmem>>, vector<1x8xi32>
      %83 = vector.broadcast %81 : vector<8x1xi32> to vector<8x8xi32>
      %84 = vector.broadcast %82 : vector<1x8xi32> to vector<8x8xi32>
      %85 = arith.cmpi eq, %83, %84 : vector<8x8xi32>
      %86 = arith.extui %85 : vector<8x8xi1> to vector<8x8xi32>
      %87 = arith.sitofp %86 : vector<8x8xi32> to vector<8x8xf32>
      %cst_28 = arith.constant dense<0.000000e+00> : vector<8xf32>
      %88 = vector.multi_reduction <add>, %87, %cst_28 [0] : vector<8x8xf32> to vector<8xf32>
      %89 = vector.shape_cast %88 : vector<8xf32> to vector<1x8xf32>
      %90 = math.rsqrt %89 : vector<1x8xf32>
      %91 = vector.broadcast %90 : vector<1x8xf32> to vector<8x8xf32>
      %92 = arith.mulf %87, %91 : vector<8x8xf32>
      %cst_29 = arith.constant 9.99999993E-9 : f32
      %93 = vector.broadcast %cst_29 : f32 to vector<8x8xf32>
      %94 = arith.addf %92, %93 : vector<8x8xf32>
      %95 = math.log %94 : vector<8x8xf32>
      %c0_30 = arith.constant 0 : index
      %c0_31 = arith.constant 0 : index
      %96 = vector.load %arg10[%c0_30, %c0_31] : memref<8x8xf32, #tpu.memory_space<vmem>>, vector<8x8xf32>
      tpu.vector_store %arg10[%c0_30, %c0_31], %95 {strides = array<i32>} : memref<8x8xf32, #tpu.memory_space<vmem>>, vector<8x8xf32>,
      %cst_32 = arith.constant 0.000000e+00 : f32
      %97 = vector.broadcast %cst_32 : f32 to vector<1x1xf32>
      %c0_33 = arith.constant 0 : index
      %c0_34 = arith.constant 0 : index
      %98 = vector.load %arg11[%c0_33, %c0_34] : memref<1x1xf32, #tpu.memory_space<vmem>>, vector<1x1xf32>
      tpu.vector_store %arg11[%c0_33, %c0_34], %97 {strides = array<i32>} : memref<1x1xf32, #tpu.memory_space<vmem>>, vector<1x1xf32>,
    } else {
    }
    %c0 = arith.constant 0 : index
    %c0_1 = arith.constant 0 : index
    %c0_2 = arith.constant 0 : index
    %3 = vector.load %arg3[%c0, %c0_1, %c0_2] : memref<1x8x32xf32, #tpu.memory_space<vmem>>, vector<1x8x32xf32>
    %4 = vector.shape_cast %3 : vector<1x8x32xf32> to vector<8x32xf32>
    %c0_3 = arith.constant 0 : index
    %c0_4 = arith.constant 0 : index
    %c0_5 = arith.constant 0 : index
    %5 = vector.load %arg4[%c0_3, %c0_4, %c0_5] : memref<1x8x32xf32, #tpu.memory_space<vmem>>, vector<1x8x32xf32>
    %6 = vector.shape_cast %5 : vector<1x8x32xf32> to vector<8x32xf32>
    %7 = arith.mulf %4, %4 : vector<8x32xf32>
    %cst = arith.constant dense<0.000000e+00> : vector<8xf32>
    %8 = vector.multi_reduction <add>, %7, %cst [1] : vector<8x32xf32> to vector<8xf32>
    %9 = vector.shape_cast %8 : vector<8xf32> to vector<8x1xf32>
    %10 = arith.mulf %6, %6 : vector<8x32xf32>
    %cst_6 = arith.constant dense<0.000000e+00> : vector<8xf32>
    %11 = vector.multi_reduction <add>, %10, %cst_6 [1] : vector<8x32xf32> to vector<8xf32>
    %12 = vector.shape_cast %11 : vector<8xf32> to vector<8x1xf32>
    %13 = math.rsqrt %9 : vector<8x1xf32>
    %14 = math.rsqrt %12 : vector<8x1xf32>
    %15 = vector.broadcast %13 : vector<8x1xf32> to vector<8x32xf32>
    %16 = arith.mulf %4, %15 : vector<8x32xf32>
    %17 = vector.broadcast %14 : vector<8x1xf32> to vector<8x32xf32>
    %18 = arith.mulf %6, %17 : vector<8x32xf32>
    %19 = arith.mulf %9, %13 : vector<8x1xf32>
    %20 = arith.mulf %12, %14 : vector<8x1xf32>
    %21 = arith.truncf %16 : vector<8x32xf32> to vector<8x32xbf16>
    %22 = arith.truncf %18 : vector<8x32xf32> to vector<8x32xbf16>
    %cst_7 = arith.constant dense<0.000000e+00> : vector<8x8xf32>
    %23 = tpu.matmul %21, %22, %cst_7 {dimension_numbers = #tpu.dot_dimension_numbers<[1], [1], [0], [0], [0, 0, 1, 0], [], []>} : vector<8x32xbf16>, vector<8x32xbf16>, vector<8x8xf32> -> vector<8x8xf32>
    %24 = vector.broadcast %19 : vector<8x1xf32> to vector<8x8xf32>
    %25 = arith.mulf %24, %23 : vector<8x8xf32>
    %26 = tpu.transpose %23, [1, 0] : vector<8x8xf32> -> vector<8x8xf32>
    %27 = vector.broadcast %20 : vector<8x1xf32> to vector<8x8xf32>
    %28 = arith.mulf %27, %26 : vector<8x8xf32>
    %c0_8 = arith.constant 0 : index
    %c0_9 = arith.constant 0 : index
    %29 = vector.load %arg10[%c0_8, %c0_9] : memref<8x8xf32, #tpu.memory_space<vmem>>, vector<8x8xf32>
    %c0_10 = arith.constant 0 : index
    %c0_11 = arith.constant 0 : index
    %30 = vector.load %arg11[%c0_10, %c0_11] : memref<1x1xf32, #tpu.memory_space<vmem>>, vector<1x1xf32>
    %cst_12 = arith.constant dense<0xFF800000> : vector<8xf32>
    %31 = vector.multi_reduction <maximumf>, %25, %cst_12 [1] : vector<8x8xf32> to vector<8xf32>
    %32 = vector.shape_cast %31 : vector<8xf32> to vector<8x1xf32>
    %33 = vector.broadcast %32 : vector<8x1xf32> to vector<8x8xf32>
    %34 = arith.subf %25, %33 : vector<8x8xf32>
    %35 = math.exp %34 : vector<8x8xf32>
    %cst_13 = arith.constant dense<0.000000e+00> : vector<8xf32>
    %36 = vector.multi_reduction <add>, %35, %cst_13 [1] : vector<8x8xf32> to vector<8xf32>
    %37 = vector.shape_cast %36 : vector<8xf32> to vector<8x1xf32>
    %38 = vector.broadcast %32 : vector<8x1xf32> to vector<8x8xf32>
    %39 = arith.subf %25, %38 : vector<8x8xf32>
    %40 = math.log %37 : vector<8x1xf32>
    %41 = vector.broadcast %40 : vector<8x1xf32> to vector<8x8xf32>
    %42 = arith.subf %39, %41 : vector<8x8xf32>
    %43 = tpu.reciprocal %37 {approx = true} : vector<8x1xf32> -> vector<8x1xf32>
    %44 = vector.broadcast %43 : vector<8x1xf32> to vector<8x8xf32>
    %45 = arith.mulf %35, %44 : vector<8x8xf32>
    %46 = arith.subf %42, %29 : vector<8x8xf32>
    %47 = arith.mulf %45, %46 : vector<8x8xf32>
    %cst_14 = arith.constant dense<0.000000e+00> : vector<8xf32>
    %48 = vector.multi_reduction <add>, %47, %cst_14 [1] : vector<8x8xf32> to vector<8xf32>
    %49 = vector.shape_cast %48 : vector<8xf32> to vector<8x1xf32>
    %cst_15 = arith.constant dense<0.000000e+00> : vector<1xf32>
    %50 = vector.multi_reduction <add>, %49, %cst_15 [0] : vector<8x1xf32> to vector<1xf32>
    %51 = vector.shape_cast %50 : vector<1xf32> to vector<1x1xf32>
    %cst_16 = arith.constant dense<0xFF800000> : vector<8xf32>
    %52 = vector.multi_reduction <maximumf>, %28, %cst_16 [1] : vector<8x8xf32> to vector<8xf32>
    %53 = vector.shape_cast %52 : vector<8xf32> to vector<8x1xf32>
    %54 = vector.broadcast %53 : vector<8x1xf32> to vector<8x8xf32>
    %55 = arith.subf %28, %54 : vector<8x8xf32>
    %56 = math.exp %55 : vector<8x8xf32>
    %cst_17 = arith.constant dense<0.000000e+00> : vector<8xf32>
    %57 = vector.multi_reduction <add>, %56, %cst_17 [1] : vector<8x8xf32> to vector<8xf32>
    %58 = vector.shape_cast %57 : vector<8xf32> to vector<8x1xf32>
    %59 = vector.broadcast %53 : vector<8x1xf32> to vector<8x8xf32>
    %60 = arith.subf %28, %59 : vector<8x8xf32>
    %61 = math.log %58 : vector<8x1xf32>
    %62 = vector.broadcast %61 : vector<8x1xf32> to vector<8x8xf32>
    %63 = arith.subf %60, %62 : vector<8x8xf32>
    %64 = tpu.reciprocal %58 {approx = true} : vector<8x1xf32> -> vector<8x1xf32>
    %65 = vector.broadcast %64 : vector<8x1xf32> to vector<8x8xf32>
    %66 = arith.mulf %56, %65 : vector<8x8xf32>
    %67 = arith.subf %63, %29 : vector<8x8xf32>
    %68 = arith.mulf %66, %67 : vector<8x8xf32>
    %cst_18 = arith.constant dense<0.000000e+00> : vector<8xf32>
    %69 = vector.multi_reduction <add>, %68, %cst_18 [1] : vector<8x8xf32> to vector<8xf32>
    %70 = vector.shape_cast %69 : vector<8xf32> to vector<8x1xf32>
    %cst_19 = arith.constant dense<0.000000e+00> : vector<1xf32>
    %71 = vector.multi_reduction <add>, %70, %cst_19 [0] : vector<8x1xf32> to vector<1xf32>
    %72 = vector.shape_cast %71 : vector<1xf32> to vector<1x1xf32>
    %73 = arith.addf %51, %72 : vector<1x1xf32>
    %cst_20 = arith.constant 1.250000e-01 : f32
    %74 = vector.broadcast %cst_20 : f32 to vector<1x1xf32>
    %75 = arith.mulf %73, %74 : vector<1x1xf32>
    %76 = arith.addf %30, %75 : vector<1x1xf32>
    %c0_21 = arith.constant 0 : index
    %c0_22 = arith.constant 0 : index
    %77 = vector.load %arg11[%c0_21, %c0_22] : memref<1x1xf32, #tpu.memory_space<vmem>>, vector<1x1xf32>
    tpu.vector_store %arg11[%c0_21, %c0_22], %76 {strides = array<i32>} : memref<1x1xf32, #tpu.memory_space<vmem>>, vector<1x1xf32>,
    %c7_i32 = arith.constant 7 : i32
    %78 = arith.cmpi eq, %arg0, %c7_i32 : i32
    %79 = arith.extui %78 : i1 to i32
    %c0_i32_23 = arith.constant 0 : i32
    %80 = arith.cmpi ne, %79, %c0_i32_23 : i32
    scf.if %80 {
      %c0_24 = arith.constant 0 : index
      %c0_25 = arith.constant 0 : index
      %81 = vector.load %arg5[%c0_24, %c0_25] : memref<8x32xf32, #tpu.memory_space<vmem>>, vector<8x32xf32>
      %c0_26 = arith.constant 0 : index
      %c0_27 = arith.constant 0 : index
      %82 = vector.load %arg6[%c0_26, %c0_27] : memref<8x32xf32, #tpu.memory_space<vmem>>, vector<8x32xf32>
      %83 = arith.subf %81, %82 : vector<8x32xf32>
      %84 = arith.mulf %83, %83 : vector<8x32xf32>
      %cst_28 = arith.constant dense<0.000000e+00> : vector<8xf32>
      %85 = vector.multi_reduction <add>, %84, %cst_28 [1] : vector<8x32xf32> to vector<8xf32>
      %86 = vector.shape_cast %85 : vector<8xf32> to vector<8x1xf32>
      %cst_29 = arith.constant dense<0.000000e+00> : vector<1xf32>
      %87 = vector.multi_reduction <add>, %86, %cst_29 [0] : vector<8x1xf32> to vector<1xf32>
      %88 = vector.shape_cast %87 : vector<1xf32> to vector<1x1xf32>
      %cst_30 = arith.constant 3.906250e-03 : f32
      %89 = vector.broadcast %cst_30 : f32 to vector<1x1xf32>
      %90 = arith.mulf %88, %89 : vector<1x1xf32>
      %c0_31 = arith.constant 0 : index
      %c0_32 = arith.constant 0 : index
      %91 = vector.load %arg1[%c0_31, %c0_32] : memref<8x1xi32, #tpu.memory_space<vmem>>, vector<8x1xi32>
      %c0_33 = arith.constant 0 : index
      %c0_34 = arith.constant 0 : index
      %92 = vector.load %arg7[%c0_33, %c0_34] : memref<8x16xf32, #tpu.memory_space<vmem>>, vector<8x16xf32>
      %c0_35 = arith.constant 0 : index
      %c0_36 = arith.constant 0 : index
      %93 = vector.load %arg8[%c0_35, %c0_36] : memref<8x16xf32, #tpu.memory_space<vmem>>, vector<8x16xf32>
      %94 = tpu.iota {dimensions = array<i32: 1>} : vector<8x16xi32>
      %95 = vector.broadcast %91 : vector<8x1xi32> to vector<8x16xi32>
      %96 = arith.cmpi eq, %94, %95 : vector<8x16xi32>
      %97 = arith.extui %96 : vector<8x16xi1> to vector<8x16xi32>
      %98 = arith.sitofp %97 : vector<8x16xi32> to vector<8x16xf32>
      %99 = arith.addf %92, %93 : vector<8x16xf32>
      %100 = arith.mulf %99, %98 : vector<8x16xf32>
      %cst_37 = arith.constant dense<0.000000e+00> : vector<8xf32>
      %101 = vector.multi_reduction <add>, %100, %cst_37 [1] : vector<8x16xf32> to vector<8xf32>
      %102 = vector.shape_cast %101 : vector<8xf32> to vector<8x1xf32>
      %cst_38 = arith.constant dense<0xFF800000> : vector<8xf32>
      %103 = vector.multi_reduction <maximumf>, %92, %cst_38 [1] : vector<8x16xf32> to vector<8xf32>
      %104 = vector.shape_cast %103 : vector<8xf32> to vector<8x1xf32>
      %105 = vector.broadcast %104 : vector<8x1xf32> to vector<8x16xf32>
      %106 = arith.subf %92, %105 : vector<8x16xf32>
      %107 = math.exp %106 : vector<8x16xf32>
      %cst_39 = arith.constant dense<0.000000e+00> : vector<8xf32>
      %108 = vector.multi_reduction <add>, %107, %cst_39 [1] : vector<8x16xf32> to vector<8xf32>
      %109 = vector.shape_cast %108 : vector<8xf32> to vector<8x1xf32>
      %110 = math.log %109 : vector<8x1xf32>
      %111 = arith.addf %104, %110 : vector<8x1xf32>
      %cst_40 = arith.constant dense<0xFF800000> : vector<8xf32>
      %112 = vector.multi_reduction <maximumf>, %93, %cst_40 [1] : vector<8x16xf32> to vector<8xf32>
      %113 = vector.shape_cast %112 : vector<8xf32> to vector<8x1xf32>
      %114 = vector.broadcast %113 : vector<8x1xf32> to vector<8x16xf32>
      %115 = arith.subf %93, %114 : vector<8x16xf32>
      %116 = math.exp %115 : vector<8x16xf32>
      %cst_41 = arith.constant dense<0.000000e+00> : vector<8xf32>
      %117 = vector.multi_reduction <add>, %116, %cst_41 [1] : vector<8x16xf32> to vector<8xf32>
      %118 = vector.shape_cast %117 : vector<8xf32> to vector<8x1xf32>
      %119 = math.log %118 : vector<8x1xf32>
      %120 = arith.addf %113, %119 : vector<8x1xf32>
      %121 = arith.addf %111, %120 : vector<8x1xf32>
      %122 = arith.subf %121, %102 : vector<8x1xf32>
      %cst_42 = arith.constant dense<0.000000e+00> : vector<1xf32>
      %123 = vector.multi_reduction <add>, %122, %cst_42 [0] : vector<8x1xf32> to vector<1xf32>
      %124 = vector.shape_cast %123 : vector<1xf32> to vector<1x1xf32>
      %cst_43 = arith.constant 6.250000e-02 : f32
      %125 = vector.broadcast %cst_43 : f32 to vector<1x1xf32>
      %126 = arith.mulf %124, %125 : vector<1x1xf32>
      %c0_44 = arith.constant 0 : index
      %c0_45 = arith.constant 0 : index
      %127 = vector.load %arg11[%c0_44, %c0_45] : memref<1x1xf32, #tpu.memory_space<vmem>>, vector<1x1xf32>
      %128 = tpu.iota {dimensions = array<i32: 1>} : vector<1x128xi32>
      %cst_46 = arith.constant 0.000000e+00 : f32
      %129 = vector.broadcast %cst_46 : f32 to vector<1x128xf32>
      %c0_i32_47 = arith.constant 0 : i32
      %130 = vector.broadcast %c0_i32_47 : i32 to vector<1x128xi32>
      %131 = arith.cmpi eq, %128, %130 : vector<1x128xi32>
      %c1_i32 = arith.constant 1 : i32
      %132 = vector.broadcast %c1_i32 : i32 to vector<1x128xi32>
      %133 = arith.cmpi eq, %128, %132 : vector<1x128xi32>
      %c2_i32 = arith.constant 2 : i32
      %134 = vector.broadcast %c2_i32 : i32 to vector<1x128xi32>
      %135 = arith.cmpi eq, %128, %134 : vector<1x128xi32>
      %136 = vector.shape_cast %126 : vector<1x1xf32> to vector<1x1xf32>
      %137 = vector.broadcast %136 : vector<1x1xf32> to vector<1x128xf32>
      %138 = arith.select %135, %137, %129 : vector<1x128xi1>, vector<1x128xf32>
      %139 = vector.shape_cast %90 : vector<1x1xf32> to vector<1x1xf32>
      %140 = vector.broadcast %139 : vector<1x1xf32> to vector<1x128xf32>
      %141 = arith.select %133, %140, %138 : vector<1x128xi1>, vector<1x128xf32>
      %142 = vector.shape_cast %127 : vector<1x1xf32> to vector<1x1xf32>
      %143 = vector.broadcast %142 : vector<1x1xf32> to vector<1x128xf32>
      %144 = arith.select %131, %143, %141 : vector<1x128xi1>, vector<1x128xf32>
      %c0_48 = arith.constant 0 : index
      %c0_49 = arith.constant 0 : index
      %145 = vector.load %arg9[%c0_48, %c0_49] : memref<1x128xf32, #tpu.memory_space<vmem>>, vector<1x128xf32>
      tpu.vector_store %arg9[%c0_48, %c0_49], %144 {strides = array<i32>} : memref<1x128xf32, #tpu.memory_space<vmem>>, vector<1x128xf32>,
    } else {
    }
    return
  }
  func.func @transform_0(%arg0: i32) -> (i32, i32) {
    %c0_i32 = arith.constant 0 : i32
    %c0_i32_0 = arith.constant 0 : i32
    %c0_i32_1 = arith.constant 0 : i32
    return %c0_i32, %c0_i32_0 : i32, i32
  }
  func.func @transform_1(%arg0: i32) -> (i32, i32) {
    %c0_i32 = arith.constant 0 : i32
    %c0_i32_0 = arith.constant 0 : i32
    %c0_i32_1 = arith.constant 0 : i32
    return %c0_i32, %c0_i32_0 : i32, i32
  }
  func.func @transform_2(%arg0: i32) -> (i32, i32, i32) {
    %c0_i32 = arith.constant 0 : i32
    %c0_i32_0 = arith.constant 0 : i32
    %c0_i32_1 = arith.constant 0 : i32
    return %arg0, %c0_i32, %c0_i32_0 : i32, i32, i32
  }
  func.func @transform_3(%arg0: i32) -> (i32, i32, i32) {
    %c0_i32 = arith.constant 0 : i32
    %c0_i32_0 = arith.constant 0 : i32
    %c0_i32_1 = arith.constant 0 : i32
    return %arg0, %c0_i32, %c0_i32_0 : i32, i32, i32
  }
  func.func @transform_4(%arg0: i32) -> (i32, i32) {
    %c0_i32 = arith.constant 0 : i32
    %c0_i32_0 = arith.constant 0 : i32
    %c0_i32_1 = arith.constant 0 : i32
    return %c0_i32, %c0_i32_0 : i32, i32
  }
  func.func @transform_5(%arg0: i32) -> (i32, i32) {
    %c0_i32 = arith.constant 0 : i32
    %c0_i32_0 = arith.constant 0 : i32
    %c0_i32_1 = arith.constant 0 : i32
    return %c0_i32, %c0_i32_0 : i32, i32
  }
  func.func @transform_6(%arg0: i32) -> (i32, i32) {
    %c0_i32 = arith.constant 0 : i32
    %c0_i32_0 = arith.constant 0 : i32
    %c0_i32_1 = arith.constant 0 : i32
    return %c0_i32, %c0_i32_0 : i32, i32
  }
  func.func @transform_7(%arg0: i32) -> (i32, i32) {
    %c0_i32 = arith.constant 0 : i32
    %c0_i32_0 = arith.constant 0 : i32
    %c0_i32_1 = arith.constant 0 : i32
    return %c0_i32, %c0_i32_0 : i32, i32
  }
  func.func @transform_8(%arg0: i32) -> (i32, i32) {
    %c0_i32 = arith.constant 0 : i32
    %c0_i32_0 = arith.constant 0 : i32
    %c0_i32_1 = arith.constant 0 : i32
    return %c0_i32, %c0_i32_0 : i32, i32
  }
}

</mosaic_0001>

<bundles_post_ra>
// kernel: tpu_custom_call.1
= control target key start
LH: loop header
LB: loop body
LE: loop exit
PB: predicated region body
PF: predicated region fallthrough
CT: control target
= control target key end

     0   :  { %s1381_s0 = inlined_call_operand.vmem [shape: s32[8,1], index: 0, kind: input, shape index: {}]   ;;  %s1382_s1 = inlined_call_operand.vmem [shape: s32[1,8], index: 1, kind: input, shape index: {}]   ;;  %s1383_s2 = inlined_call_operand.hbm [shape: f32[8,8,32], index: 2, kind: input, shape index: {}]   ;;  %s1384_s3 = inlined_call_operand.hbm [shape: f32[8,8,32], index: 3, kind: input, shape index: {}]   ;;  %s1385_s4 = inlined_call_operand.vmem [shape: f32[8,32], index: 4, kind: input, shape index: {}]   ;;  %s1386_s5 = inlined_call_operand.hbm [shape: f32[8,32], index: 5, kind: input, shape index: {}]   ;;  %s1387_s6 = inlined_call_operand.hbm [shape: f32[8,16], index: 6, kind: input, shape index: {}]   ;;  %s1388_s7 = inlined_call_operand.hbm [shape: f32[8,16], index: 7, kind: input, shape index: {}]   ;;  %s1389_s8 = inlined_call_operand.hbm [shape: f32[1,128], index: 8, kind: output, shape index: {}]  }
   0x1   :  { %1390 = sst [smem:[#allocation19_spill]] %s1386_s5 }
   0x2   :  { %1391 = sst [smem:[#allocation20_spill]] %s1387_s6 }
   0x3   :  { %1392 = sst [smem:[#allocation21_spill]] %s1388_s7 }
   0x4   :  { %13 = vsyncpa [#allocation5], 0 }
   0x5   :  { %15 = vsyncpa [#allocation5 + $0x1], 0 }
   0x6   :  { %16 = vsyncpa [#allocation8], 0 }
   0x7   :  { %18 = vsyncpa [#allocation8 + $0x1], 0 }
   0x8   :  { %19 = vsyncpa [#allocation11], 0 }
   0x9   :  { %20 = vsyncpa [#allocation6], 0  ;;  %s1200_s27 = smov 0   ;;  %s1202_s28 = smov 0  }
   0xa   :  { %s1204_s29 = smov 0   ;;  %s1206_s30 = smov 0  }
   0xb LB: > { %s1219_s9 = sadd.s32 4294967295, %s1145_s30   ;;  %p88_p0 = scmp.ne.s32.totalorder %s1137_s28, %s1133_s27  ;;  %s1145_s30 = sphi %s1206_s30, %s1403_s30   ;;  %s1141_s29 = sphi %s1204_s29, %s1402_s29   ;;  %s1137_s28 = sphi %s1202_s28, %s1401_s28   ;;  %s1133_s27 = sphi %s1200_s27, %s1400_s27  }
   0xc   : > { %p89_p1 = scmp.eq.s32.totalorder %s1219_s9, 0  ;;  %p773_p2 = scmp.ge.s32.totalorder %s1145_s30, 1 }
   0xd   : > { %p230_p3 = scmp.lt.s32.totalorder %s1145_s30, 9  ;;  %p774_p4 = scmp.ne.s32.totalorder %s1219_s9, 0 }
   0xe   : > { %p1228_p5 = por %p89_p1, %p88_p0  ;;  %s1394_s5 = sld [smem:[#allocation19_spill]] }
   0xf   : > { %p1235_p6 = pnand %p773_p2, %p230_p3  ;;  %s1147_s15 = smov [#allocation9]  }
  0x10   : > { %s253_s16 = sshll.u32 %s1147_s15, 4  ;;  %s1396_s6 = sld [smem:[#allocation20_spill]]  ;;  %s254_s16 = int_to_ptr.vmem [resolvable:$true] %s253_s16 }
  0x11   : > { %p817_p7 = pneg %p1235_p6  ;;  %s1397_s7 = sld [smem:[#allocation21_spill]] }
  0x12   : > { %s1148_s23 = smov [#allocation10]   ;;  %s1149_s25 = smov [#allocation12]  }
  0x13   : > { %p818_p8 = pnand %p817_p7, %p89_p1  ;;  %s265_s24 = sshll.u32 %s1148_s23, 4  ;;  %s266_s24 = int_to_ptr.vmem [resolvable:$true] %s265_s24 }
  0x14   : > { %s251_s13 = sshll.u32 %s1394_s5, 4  ;;  %s277_s26 = sshll.u32 %s1149_s25, 4  ;;  %s252_s13 = int_to_ptr.hbm [resolvable:$true] %s251_s13  ;;  %s278_s26 = int_to_ptr.vmem [resolvable:$true] %s277_s26 }
  0x15   : > { %820 = dma.hbm_to_vmem [thread:$0]  (!%p818_p8), %s252_s13, 128, %s254_s16, [#allocation8]  }
  0x16   : > { %s263_s19 = sshll.u32 %s1396_s6, 4  ;;  %s1250_s27 = sadd.s32 1, %s1145_s30   ;;  %s264_s19 = int_to_ptr.hbm [resolvable:$true] %s263_s19 }
  0x17   : > { %s275_s22 = sshll.u32 %s1397_s7, 4  ;;  %s72_s11 = ssub.s32 %s1145_s30, %s1250_s27  ;;  %s276_s22 = int_to_ptr.hbm [resolvable:$true] %s275_s22 }
  0x18   : > { %823 = dma.hbm_to_vmem [thread:$0]  (!%p818_p8), %s264_s19, 128, %s266_s24, [#allocation11]  }
  0x19   : > { %826 = dma.hbm_to_vmem [thread:$0]  (!%p818_p8), %s276_s22, 128, %s278_s26, [#allocation11]  }
  0x1a   : > { %s75_s12 = sadd.s32 1, %s1141_s29  ;;  %p73_p9 = scmp.eq.s32.totalorder %s72_s11, 0 }
  0x1b   : > { %p82_p10 = scmp.ne.s32.totalorder %s1141_s29, %s1137_s28  ;;  %p83_p11 = scmp.eq.s32.totalorder %s1145_s30, 0 }
  0x1c   : > { %p837_p12 = scmp.lt.s32.totalorder %s1145_s30, 8  ;;  %s288_s15 = sand.u32 1, %s1141_s29  }
  0x1d   : > { %s1260_s13 = scalar_select %p73_p9, %s1141_s29, %s75_s12  }
  0x1e   : > { %p84_p13 = por %p83_p11, %p82_p10  ;;  %s1263_s16 = sshll.u32 %s288_s15, 3 }
  0x1f   : > { %s779_s17 = sshll.u32 %s1145_s30, 3  ;;  %s292_s21 = scalar_lea.vmem [#allocation4], %s1263_s16 }
  0x20   : > { %s296_s20 = scalar_lea.hbm %s1383_s2, %s779_s17  ;;  %s300_s22 = sshll.u32 %s292_s21, 4  ;;  %s301_s22 = int_to_ptr.vmem [resolvable:$true] %s300_s22 }
  0x21   : > { %s298_s23 = sshll.u32 %s296_s20, 4  ;;  %p1270_p0 = pnand %p837_p12, %p84_p13  ;;  %s299_s23 = int_to_ptr.hbm [resolvable:$true] %s298_s23 }
  0x22   : > { %s315_s11 = scalar_lea.hbm %s1384_s3, %s779_s17  ;;  %s307_s12 = sand.u32 1, %s1145_s30  }
  0x23   : > { %s289_s5 = scalar_lea.sflag [#allocation5], %s288_s15  ;;  %s1007_s6 = sshra.s32 %s299_s23, 4  ;;  %s1008_s6 = int_to_ptr.hbm [resolvable:$true] %s1007_s6 }
  0x24   : > { %s1009_s18 = scalar_lea.hbm %s1008_s6, 8  ;;  %p1011_p3 = pneg %p1270_p0 }
  0x25   : > { %p1010_p2 = scmp.ne.s32.totalorder %s1008_s6, %s1009_s18  ;;  %s1014_s21 = scalar_lea.hbm %s1383_s2, 64 }
  0x26   : > { %p1015_p9 = scmp.lt.s32.totalorder %s1008_s6, %s1383_s2  ;;  %p1016_p10 = scmp.lt.s32.totalorder %s1014_s21, %s1009_s18 }
  0x27   : > { %p1012_p7 = pnand %p1011_p3, %p1010_p2 }
  0x28   : > { %p1017_p11 = por %p1016_p10, %p1015_p9 }
  0x29   : > { %p1013_p8 = pneg %p1012_p7 }
  0x2b   : > { %p1018_p12 = pnand %p1017_p11, %p1013_p8 }
  0x2d   : > { %1021 = shalt.err (!%p1018_p12)
}
  0x2e   : > { %830 = dma.hbm_to_vmem [thread:$0]  (!%p1270_p0), %s299_s23, 128, %s301_s22, %s289_s5  }
  0x2f   : > { %s317_s30 = sshll.u32 %s315_s11, 4  ;;  %s311_s15 = scalar_lea.vmem [#allocation7], %s1263_s16  ;;  %s318_s30 = int_to_ptr.hbm [resolvable:$true] %s317_s30 }
  0x30   : > { %s319_s17 = sshll.u32 %s311_s15, 4  ;;  %s308_s19 = scalar_lea.sflag [#allocation8], %s307_s12  ;;  %s320_s17 = int_to_ptr.vmem [resolvable:$true] %s319_s17 }
  0x31   : > { %s1037_s20 = sshra.s32 %s318_s30, 4  ;;  %s1044_s21 = scalar_lea.hbm %s1384_s3, 64  ;;  %s1038_s20 = int_to_ptr.hbm [resolvable:$true] %s1037_s20 }
  0x32   : > { %s1039_s7 = scalar_lea.hbm %s1038_s20, 8  ;;  %p1045_p8 = scmp.lt.s32.totalorder %s1038_s20, %s1384_s3 }
  0x33   : > { %p1040_p13 = scmp.ne.s32.totalorder %s1038_s20, %s1039_s7  ;;  %p1046_p9 = scmp.lt.s32.totalorder %s1044_s21, %s1039_s7 }
  0x35   : > { %p1042_p2 = pnand %p1040_p13, %p1011_p3  ;;  %p1047_p10 = por %p1046_p9, %p1045_p8 }
  0x37   : > { %p1043_p7 = pneg %p1042_p2 }
  0x39   : > { %p1048_p11 = pnand %p1047_p10, %p1043_p7 }
  0x3b   : > { %1051 = shalt.err (!%p1048_p11)
}
  0x3c   : > { %833 = dma.hbm_to_vmem [thread:$0]  (!%p1270_p0), %s318_s30, 128, %s320_s17, %s308_s19  }
  0x3d   : > { %328 = sbr.rel (%p1235_p6) target bundleno = 1374 (0x55e), region = 52  ;;  %s330_s16 = sand.u32 (!%p1235_p6), 1, %s1137_s28  }
  0x3e   : > { %s1306_s22 = sshll.u32 (!%p1235_p6), %s330_s16, 3  ;;  %s331_s23 = scalar_lea.sflag (!%p1235_p6), [#allocation5], %s330_s16 }
  0x3f   : > { %s334_s11 = scalar_lea.vmem (!%p1235_p6), [#allocation4], %s1306_s22 }
  0x42   : > { %1112 = dma.done.wait (%p1228_p5), %s331_s23, 128  }
  0x43   : > { %1114 = vsyncadd (%p1228_p5), %s331_s23, 4294967168  ;;  %s340_s7 = sand.u32 1, %s1219_s9   ;;  %s344_s14 = scalar_lea.vmem [#allocation7], %s1306_s22 }
  0x44   : > { %s341_s24 = scalar_lea.sflag [#allocation8], %s340_s7 }
  0x45   : > { %1116 = dma.done.wait (%p1228_p5), %s341_s24, 128  }
  0x46   : > { %1118 = vsyncadd (%p1228_p5), %s341_s24, 4294967168 }
  0x47   : > { %1120 = dma.done.wait (%p89_p1), [#allocation8], 128  }
  0x48   : > { %1122 = vsyncadd (%p89_p1), [#allocation8], 4294967168 }
  0x49   : > { %1124 = dma.done.wait (%p89_p1), [#allocation11], 256  }
  0x4a   : > { %1126 = vsyncadd (%p89_p1), [#allocation11], 4294967040  ;;  %397 = sbr.rel (%p774_p4) target bundleno = 243 (0xf3), region = 76 }
  0x4f   : > { %v398_v0 = vld [vmem:[%s1381_s0] sm:$0xff]  ;;  %v1150_v1 = vmov 0   ;;  %vm430_vm0 = vcmask 0   ;;  %v1151_v2 = vmov 0.0   ;;  %vm407_vm1 = vcmask 64512  }
  0x50   : > { %884 = vset.pattern.permute.xlu0 %v1150_v1  ;;  %431 = vst.msk [vmem:[#allocation3] sm:$0x1] %vm430_vm0, %v1151_v2  ;;  %v885_v3 = vld [vmem:[%s1382_s1] ss:$0 sm:$0xff] }
  0x51   : > { %401 = vperm.xlu0 %884, %v398_v0  }
  0xc3   : > { %v402_v4 = vpop.permute.xlu0 %401 }
  0xc4   : > { %vm404_vm2 = vcmp.eq.s32.totalorder %v402_v4, %v885_v3 }
  0xc5   : > { %v789_v5 = vsel %vm404_vm2, 1.0, %v1151_v2 }
  0xc6   : > { %v408_v6 = vsel %vm407_vm1, %v789_v5, 0.0 }
  0xc7   : > { %v409_v7 = vrot.slane %v408_v6, 4 }
  0xc9   : > { %v410_v8 = vadd.f32 %v409_v7, %v408_v6 }
  0xcb   : > { %v411_v9 = vrot.slane %v410_v8, 2 }
  0xcd   : > { %v412_v10 = vadd.f32 %v411_v9, %v410_v8 }
  0xcf   : > { %v413_v11 = vrot.slane %v412_v10, 1 }
  0xd1   : > { %v414_v12 = vadd.f32 %v413_v11, %v412_v10 }
  0xd3   : > { %886 = vrsqrt.f32 %v414_v12  ;;  %vm421_vm4 = vweird.f32 %v414_v12 }
  0xd9   : > { %v887_v13 = vpop.eup %886 }
  0xda   : > { %v416_v14 = vmul.f32 %v887_v13, %v414_v12  ;;  %vm422_vm3 = vweird.f32 %v887_v13 }
  0xdb   : > { %vm423_vm5 = vmor %vm421_vm4, %vm422_vm3 }
  0xdc   : > { %v417_v15 = vmul.f32 %v887_v13, %v416_v14 }
  0xde   : > { %v418_v16 = vmul.f32 0.5, %v417_v15 }
  0xe0   : > { %v419_v17 = vsub.f32 1.5, %v418_v16 }
  0xe2   : > { %v420_v18 = vmul.f32 %v887_v13, %v419_v17 }
  0xe4   : > { %v424_v19 = vsel %vm423_vm5, %v887_v13, %v420_v18 }
  0xe5   : > { %v425_v20 = vmul.f32 %v789_v5, %v424_v19 }
  0xe7   : > { %v426_v21 = vadd.f32 1e-08, %v425_v20 }
  0xe9   : > { %888 = vlog2.f32 %v426_v21 }
  0xef   : > { %v889_v22 = vpop.eup %888 }
  0xf0   : > { %v428_v23 = vmul.f32 0.6931472, %v889_v22 }
  0xf2   : > { %429 = vst.msk [vmem:[#allocation2] sm:$0xff] %vm407_vm1, %v428_v23 }
  0xf3 PF: > { %v433_v24 = vld [vmem:[%s344_s14] sm:$0xff]  ;;  %vm435_vm6 = vcmask 261120   ;;  %v432_v26 = vld [vmem:[%s334_s11] sm:$0xff]  ;;  %vm524_vm13 = vcmask 64512   ;;  %vm578_vm14 = vcmask 0   ;;  %p791_p1 = scmp.ne.s32.totalorder %s1219_s9, 7 }
  0xf4   : > { %v439_v25 = vmul.f32 %v433_v24, %v433_v24  ;;  %v434_v28 = vmul.f32 %v432_v26, %v432_v26 }
  0xf6   : > { %v440_v27 = vsel %vm435_vm6, %v439_v25, 0.0  ;;  %v436_v29 = vsel %vm435_vm6, %v434_v28, 0.0 }
  0xf7   : > { %441 = vadd.xlane.f32.xlu0 %v440_v27 }
  0xf9   : > { %v522_v10 = vld [vmem:[#allocation2] sm:$0xff] }
  0xff   : > { %437 = vadd.xlane.f32.xlu0 %v436_v29 }
 0x16a   : > { %v442_v30 = vpop.xlane.xlu0 %441 }
 0x16b   : > { %890 = vrsqrt.f32 %v442_v30  ;;  %vm459_vm8 = vweird.f32 %v442_v30 }
 0x171   : > { %v891_v31 = vpop.eup %890 }
 0x172   : > { %v454_v32 = vmul.f32 %v891_v31, %v442_v30  ;;  %v438_v33 = vpop.xlane.xlu0 %437  ;;  %vm460_vm7 = vweird.f32 %v891_v31 }
 0x173   : > { %892 = vrsqrt.f32 %v438_v33  ;;  %vm461_vm9 = vmor %vm459_vm8, %vm460_vm7  ;;  %vm449_vm11 = vweird.f32 %v438_v33 }
 0x174   : > { %v455_v34 = vmul.f32 %v891_v31, %v454_v32 }
 0x176   : > { %v456_v35 = vmul.f32 0.5, %v455_v34 }
 0x178   : > { %v457_v36 = vsub.f32 1.5, %v456_v35 }
 0x179   : > { %v893_v37 = vpop.eup %892 }
 0x17a   : > { %v444_v38 = vmul.f32 %v893_v37, %v438_v33  ;;  %v458_v39 = vmul.f32 %v891_v31, %v457_v36  ;;  %vm450_vm10 = vweird.f32 %v893_v37 }
 0x17b   : > { %vm451_vm12 = vmor %vm449_vm11, %vm450_vm10 }
 0x17c   : > { %v445_v40 = vmul.f32 %v893_v37, %v444_v38  ;;  %v462_v41 = vsel %vm461_vm9, %v891_v31, %v458_v39 }
 0x17d   : > { %v464_v42 = vmul.f32 %v462_v41, %v433_v24  ;;  %v466_v43 = vmul.f32 %v462_v41, %v442_v30 }
 0x17e   : > { %v446_v44 = vmul.f32 0.5, %v445_v40  ;;  %v523_v40 = vld [vmem:[#allocation3] sm:$0x1] }
 0x17f   : > { %v468_v45 = vpack.c.bf16 %v464_v42, %v464_v42 }
 0x180   : > { %v447_v46 = vsub.f32 1.5, %v446_v44 }
 0x181   : > { %v473_v47 = vsel %vm435_vm6, %v468_v45, 0 }
 0x182   : > { %482 = vmatpush.bf16.xpose.msra.mxu0 %v473_v47  ;;  %v448_v48 = vmul.f32 %v893_v37, %v447_v46 }
 0x184   : > { %v452_v49 = vsel %vm451_vm12, %v893_v37, %v448_v48 }
 0x185   : > { %v463_v50 = vmul.f32 %v452_v49, %v432_v26  ;;  %v465_v52 = vmul.f32 %v452_v49, %v438_v33 }
 0x187   : > { %v467_v51 = vpack.c.bf16 %v463_v50, %v463_v50 }
 0x189   : > { %790 = vmatmul.msk.bf16.vlgmr.msra.gmra.mxu0 %vm435_vm6, %v467_v51 }
 0x206   : > { %v484_v53 = vpop.f32.mrf.mxu0 }
 0x207   : > { %v488_v54 = vmul.f32 %v484_v53, %v465_v52  ;;  %489 = vxpose.xlu1.b32.start.end [1/1] (short) (narrow) %v484_v53, 8 }
 0x209   : > { %v525_v56 = vsel %vm524_vm13, %v488_v54, -inf }
 0x20e   : > { %v486_v55 = vpop.f32.mrf.mxu0 }
 0x267   : > { %526 = vmax.xlane.f32.xlu1 %v525_v56 }
 0x2ab   : > { %v505_v57 = vpop.trf.xlu1 }
 0x2ac   : > { %v521_v58 = vmul.f32 %v505_v57, %v466_v43 }
 0x2ae   : > { %v550_v59 = vsel %vm524_vm13, %v521_v58, -inf }
 0x2af   : > { %551 = vmax.xlane.f32.xlu2 %v550_v59 }
 0x2da   : > { %v527_v60 = vpop.xlane.xlu1 %526 }
 0x2db   : > { %v528_v61 = vsub.f32 %v488_v54, %v527_v60 }
 0x2dd   : > { %v529_v62 = vmul.f32 1.442695, %v528_v61 }
 0x2df   : > { %894 = vpow2.f32 %v529_v62 }
 0x2e5   : > { %v895_v63 = vpop.eup %894 }
 0x2e6   : > { %v531_v0 = vsel %vm524_vm13, %v895_v63, 0.0 }
 0x2e7   : > { %532 = vadd.xlane.f32.xlu2 %v531_v0 }
 0x322   : > { %v552_v1 = vpop.xlane.xlu2 %551 }
 0x323   : > { %v553_v2 = vsub.f32 %v521_v58, %v552_v1 }
 0x325   : > { %v554_v3 = vmul.f32 1.442695, %v553_v2 }
 0x327   : > { %896 = vpow2.f32 %v554_v3 }
 0x32d   : > { %v897_v4 = vpop.eup %896 }
 0x32e   : > { %v556_v5 = vsel %vm524_vm13, %v897_v4, 0.0 }
 0x32f   : > { %557 = vadd.xlane.f32.xlu0 %v556_v5 }
 0x35a   : > { %v533_v6 = vpop.xlane.xlu2 %532 }
 0x35b   : > { %898 = vlog2.f32 %v533_v6 }
 0x35c   : > { %900 = vrcp.f32 %v533_v6 }
 0x361   : > { %v899_v7 = vpop.eup %898 }
 0x362   : > { %v535_v8 = vmul.f32 0.6931472, %v899_v7  ;;  %v901_v9 = vpop.eup %900 }
 0x363   : > { %v538_v12 = vmul.f32 %v901_v9, %v895_v63 }
 0x364   : > { %v536_v11 = vsub.f32 %v528_v61, %v535_v8 }
 0x366   : > { %v539_v13 = vsub.f32 %v536_v11, %v522_v10 }
 0x368   : > { %v540_v14 = vmul.f32 %v539_v13, %v538_v12 }
 0x36a   : > { %v541_v15 = vsel %vm524_vm13, %v540_v14, 0.0 }
 0x36b   : > { %542 = vadd.xlane.f32.xlu2 %v541_v15 }
 0x3a2   : > { %v558_v16 = vpop.xlane.xlu0 %557 }
 0x3a3   : > { %902 = vlog2.f32 %v558_v16 }
 0x3a4   : > { %904 = vrcp.f32 %v558_v16 }
 0x3a9   : > { %v903_v17 = vpop.eup %902 }
 0x3aa   : > { %v560_v18 = vmul.f32 0.6931472, %v903_v17  ;;  %v905_v19 = vpop.eup %904 }
 0x3ab   : > { %v563_v21 = vmul.f32 %v905_v19, %v897_v4 }
 0x3ac   : > { %v561_v20 = vsub.f32 %v553_v2, %v560_v18 }
 0x3ae   : > { %v564_v22 = vsub.f32 %v561_v20, %v522_v10 }
 0x3b0   : > { %v565_v23 = vmul.f32 %v564_v22, %v563_v21 }
 0x3b2   : > { %v566_v24 = vsel %vm524_vm13, %v565_v23, 0.0 }
 0x3b3   : > { %567 = vadd.xlane.f32.xlu0 %v566_v24 }
 0x3de   : > { %v543_v25 = vpop.xlane.xlu2 %542 }
 0x3df   : > { %v544_v26 = vrot.slane %v543_v25, 4 }
 0x3e1   : > { %v545_v27 = vadd.f32 %v544_v26, %v543_v25 }
 0x3e3   : > { %v546_v28 = vrot.slane %v545_v27, 2 }
 0x3e5   : > { %v547_v31 = vadd.f32 %v546_v28, %v545_v27 }
 0x3e7   : > { %v548_v34 = vrot.slane %v547_v31, 1 }
 0x3e9   : > { %v549_v37 = vadd.f32 %v548_v34, %v547_v31 }
 0x426   : > { %v568_v29 = vpop.xlane.xlu0 %567 }
 0x427   : > { %v569_v30 = vrot.slane %v568_v29, 4 }
 0x429   : > { %v570_v32 = vadd.f32 %v569_v30, %v568_v29 }
 0x42b   : > { %v571_v33 = vrot.slane %v570_v32, 2 }
 0x42d   : > { %v572_v35 = vadd.f32 %v571_v33, %v570_v32 }
 0x42f   : > { %v573_v36 = vrot.slane %v572_v35, 1 }
 0x431   : > { %v574_v38 = vadd.f32 %v573_v36, %v572_v35 }
 0x433   : > { %v575_v39 = vadd.f32 %v574_v38, %v549_v37 }
 0x435   : > { %v576_v41 = vmul.f32 0.125, %v575_v39  ;;  %583 = sbr.rel (%p791_p1) target bundleno = 1369 (0x559), region = 80 }
 0x437   : > { %v577_v42 = vadd.f32 %v576_v41, %v523_v40 }
 0x439   : > { %579 = vst.msk [vmem:[#allocation3] sm:$0x1] %vm578_vm14, %v577_v42 }
 0x43a   : > { %v599_v43 = vld [vmem:[#allocation10] sm:$0xff]  ;;  %vm611_vm15 = vcmask 130048   ;;  %v598_v44 = vld [vmem:[%s1381_s0] sm:$0xff]  ;;  %v1152_v46 = vmov 0   ;;  %v585_v50 = vld [vmem:[#allocation9] sm:$0xff]  ;;  %v601_v52 = vlaneseq  ;;  %v1153_v60 = vmov 0.0  }
 0x43b   : > { %v615_v45 = vsel %vm611_vm15, %v599_v43, -inf  ;;  %906 = vset.pattern.permute.xlu1 %v1152_v46  ;;  %907 = vset.pattern.permute.xlu2 %v1152_v46  ;;  %v600_v47 = vld [vmem:[#allocation12] sm:$0xff] }
 0x43c   : > { %616 = vmax.xlane.f32.xlu0 %v615_v45  ;;  %604 = vperm.xlu1 %906, %v598_v44   ;;  %v627_v48 = vsel %vm611_vm15, %v600_v47, -inf  ;;  %v584_v49 = vld [vmem:[%s1385_s4] sm:$0xff]  ;;  %v602_v55 = vand.u32 127, %v601_v52  ;;  %v609_v56 = vadd.f32 %v600_v47, %v599_v43 }
 0x43d   : > { %908 = vset.pattern.permute.xlu0 %v1152_v46  ;;  %v586_v51 = vsub.f32 %v584_v49, %v585_v50 }
 0x43e   : > { %vm651_vm1 = vcmp.eq.s32.totalorder %v602_v55, 2  ;;  %vm650_vm2 = vcmp.eq.s32.totalorder %v602_v55, 1  ;;  %vm649_vm3 = vcmp.eq.s32.totalorder %v602_v55, 0 }
 0x43f   : > { %v587_v53 = vmul.f32 %v586_v51, %v586_v51 }
 0x440   : > { %v648_v8 = vld [vmem:[#allocation3] sm:$0x1] }
 0x441   : > { %v588_v54 = vsel %vm435_vm6, %v587_v53, 0.0 }
 0x444   : > { %628 = vmax.xlane.f32.xlu0 %v627_v48 }
 0x44c   : > { %589 = vadd.xlane.f32.xlu0 %v588_v54 }
 0x4ae   : > { %v605_v57 = vpop.permute.xlu1 %604 }
 0x4af   : > { %v617_v58 = vpop.xlane.xlu0 %616  ;;  %vm606_vm0 = vcmp.eq.s32.totalorder %v602_v55, %v605_v57 }
 0x4b0   : > { %v618_v59 = vsub.f32 %v599_v43, %v617_v58  ;;  %v792_v61 = vsel %vm606_vm0, 1.0, %v1153_v60 }
 0x4b1   : > { %v610_v62 = vmul.f32 %v792_v61, %v609_v56 }
 0x4b2   : > { %v619_v63 = vmul.f32 1.442695, %v618_v59 }
 0x4b3   : > { %v612_v0 = vsel %vm611_vm15, %v610_v62, 0.0 }
 0x4b4   : > { %909 = vpow2.f32 %v619_v63  ;;  %613 = vadd.xlane.f32.xlu2 %v612_v0 }
 0x4b7   : > { %v629_v1 = vpop.xlane.xlu0 %628 }
 0x4b8   : > { %v630_v2 = vsub.f32 %v600_v47, %v629_v1 }
 0x4ba   : > { %v910_v3 = vpop.eup %909  ;;  %v631_v4 = vmul.f32 1.442695, %v630_v2 }
 0x4bb   : > { %v621_v5 = vsel %vm611_vm15, %v910_v3, 0.0 }
 0x4bc   : > { %911 = vpow2.f32 %v631_v4  ;;  %622 = vadd.xlane.f32.xlu1 %v621_v5 }
 0x4bf   : > { %v590_v12 = vpop.xlane.xlu0 %589 }
 0x4c0   : > { %v591_v14 = vrot.slane %v590_v12, 4 }
 0x4c2   : > { %v912_v6 = vpop.eup %911  ;;  %v592_v18 = vadd.f32 %v591_v14, %v590_v12 }
 0x4c3   : > { %v633_v7 = vsel %vm611_vm15, %v912_v6, 0.0 }
 0x4c4   : > { %634 = vadd.xlane.f32.xlu2 %v633_v7  ;;  %v593_v22 = vrot.slane %v592_v18, 2 }
 0x4c6   : > { %v594_v25 = vadd.f32 %v593_v22, %v592_v18 }
 0x4c8   : > { %v595_v28 = vrot.slane %v594_v25, 1 }
 0x4ca   : > { %v596_v31 = vadd.f32 %v595_v28, %v594_v25 }
 0x4cc   : > { %v597_v36 = vmul.f32 0.00390625, %v596_v31 }
 0x4dc   : > { %656 = vperm.xlu2 %907, %v648_v8  }
 0x527   : > { %v614_v9 = vpop.xlane.xlu2 %613 }
 0x52f   : > { %v623_v10 = vpop.xlane.xlu1 %622 }
 0x530   : > { %913 = vlog2.f32 %v623_v10 }
 0x536   : > { %v914_v13 = vpop.eup %913 }
 0x537   : > { %v635_v11 = vpop.xlane.xlu2 %634  ;;  %v625_v15 = vmul.f32 0.6931472, %v914_v13 }
 0x538   : > { %915 = vlog2.f32 %v635_v11 }
 0x539   : > { %v626_v19 = vadd.f32 %v625_v15, %v617_v58 }
 0x53e   : > { %v916_v16 = vpop.eup %915 }
 0x53f   : > { %v637_v17 = vmul.f32 0.6931472, %v916_v16  ;;  %v657_v32 = vpop.permute.xlu2 %656 }
 0x540   : > { %v659_v35 = vperm.slane %v657_v32, 0 }
 0x541   : > { %v638_v20 = vadd.f32 %v637_v17, %v629_v1 }
 0x543   : > { %v639_v21 = vadd.f32 %v638_v20, %v626_v19 }
 0x545   : > { %v640_v23 = vsub.f32 %v639_v21, %v614_v9 }
 0x547   : > { %v641_v24 = vrot.slane %v640_v23, 4 }
 0x549   : > { %v642_v26 = vadd.f32 %v641_v24, %v640_v23 }
 0x54b   : > { %v643_v27 = vrot.slane %v642_v26, 2 }
 0x54d   : > { %v644_v29 = vadd.f32 %v643_v27, %v642_v26 }
 0x54f   : > { %v645_v30 = vrot.slane %v644_v29, 1 }
 0x551   : > { %v646_v33 = vadd.f32 %v645_v30, %v644_v29 }
 0x553   : > { %v647_v34 = vmul.f32 0.0625, %v646_v33 }
 0x555   : > { %v652_v37 = vsel %vm651_vm1, %v647_v34, 0.0 }
 0x556   : > { %v653_v38 = vsel %vm650_vm2, %v597_v36, %v652_v37 }
 0x557   : > { %v660_v39 = vsel %vm649_vm3, %v659_v35, %v653_v38 }
 0x558   : > { %661 = vst [vmem:[#allocation13] sm:$0x1] %v660_v39 }
 0x559 PF: > { %p841_p4 = scmp.eq.s32.totalorder %s1219_s9, 7  ;;  %s1154_s6 = smov [#allocation13]  }
 0x55a   : > { %s668_s18 = sshll.u32 %s1154_s6, 4  ;;  %s670_s5 = sshll.u32 %s1389_s8, 4  ;;  %s669_s18 = int_to_ptr.vmem [resolvable:$true] %s668_s18  ;;  %s671_s5 = int_to_ptr.hbm [resolvable:$true] %s670_s5 }
 0x55b   : > { %814 = dma.vmem_to_hbm [thread:$0]  (%p841_p4), %s669_s18, 16, %s671_s5, [#allocation6]  }
 0x55c   : > { %1128 = dma.done.wait (%p841_p4), [#allocation6], 16  }
 0x55d   : > { %1130 = vsyncadd (%p841_p4), [#allocation6], 4294967280 }
 0x55e PF: > { %s1399_s16 = smov %s1250_s27  ;;  %p23_p5 = scmp.ge.s32.totalorder %s1250_s27, 10  }
 0x55f   : > { %s1400_s27 = smov %s1137_s28  ;;  %s1401_s28 = smov %s1141_s29 }
 0x560   : > { %s1402_s29 = smov %s1260_s13  ;;  %s1403_s30 = smov %s1399_s16 }
 0x561   :  { %25 = sbr.rel (!%p23_p5) target bundleno = 11 (0xb), region = 122 }
 0x566   :  { %684 = vsyncpa [#allocation5], 1 }
 0x567   :  { %686 = vsyncpa [#allocation5 + $0x1], 1 }
 0x568   :  { %687 = vsyncpa [#allocation8], 1 }
 0x569   :  { %689 = vsyncpa [#allocation8 + $0x1], 1 }
 0x56a   :  { %690 = vsyncpa [#allocation11], 1 }
 0x56b   :  { %691 = vsyncpa [#allocation6], 1 }
 0x56c   :  { %693 = vsyncpa [#allocation6 + $0x1], 1 }

</bundles_post_ra>
